<compile_context>
chip_gen: v5e
topology: v5e:2x2
jax: 0.10.0
libtpu: 0.0.40
codegen_flags: <defaults>
</compile_context>

<pallas_src>
import functools

import jax
import jax.numpy as jnp
from jax.experimental import pallas as pl
from jax.experimental.pallas import tpu as pltpu

BATCH = 16            # batch_size fixed by the PyTorch module
IN_DIM = 28 * 28      # 784
HID_DIM = 20
OUT_PAD = 896         # 7 * 128, lane-dense decoder output width


def autoencoder_kernel(x_ref, we_ref, wd_ref, b_ref, out_ref):
    # x_ref:   (tile, 784)  f32  flattened input rows
    # we_ref:  (784, 20)    bf16 encoder weight, pre-transposed (W_e^T)
    # wd_ref:  (20, 896)    bf16 decoder weight, pre-transposed + lane-padded
    # b_ref:   (1, 896)     f32  fused bias (b_enc @ W_d^T + b_dec), zero-padded
    # out_ref: (tile, 896)  f32  reconstruction (columns 784: are exact zeros)
    x = x_ref[...].astype(jnp.bfloat16)
    # Encoder matmul: bf16 MXU operands, f32 accumulation.
    h = jnp.dot(x, we_ref[...], preferred_element_type=jnp.float32)        # (tile, 20)
    # Decoder matmul: cast hidden to bf16 for the MXU, accumulate in f32.
    y = jnp.dot(h.astype(jnp.bfloat16), wd_ref[...],
                preferred_element_type=jnp.float32)                         # (tile, 896)
    # Bias add stays in f32 (v5e VPU has no bf16 ALU); lane-dense store.
    out_ref[...] = (y + b_ref[...]).astype(out_ref.dtype)


def preprocess_params(w_enc, b_enc, w_dec, b_dec):
    """One-time preprocessing: transpose, bf16 cast, bias fold, lane-pad 784->896.

    w_enc: (20, 784)  PyTorch nn.Linear layout (out_features, in_features)
    b_enc: (20,)
    w_dec: (784, 20)
    b_dec: (784,)
    Returns (we_t_bf16 (784,20), wd_t_pad_bf16 (20,896), b_pad_f32 (1,896)).
    """
    w_enc = jnp.asarray(w_enc, jnp.float32)
    b_enc = jnp.asarray(b_enc, jnp.float32)
    w_dec = jnp.asarray(w_dec, jnp.float32)
    b_dec = jnp.asarray(b_dec, jnp.float32)

    we_t = w_enc.T.astype(jnp.bfloat16)                                    # (784, 20)
    # Fold encoder bias through the (linear) decoder, in full f32.
    b_fused = b_enc @ w_dec.T + b_dec                                      # (784,)
    # Lane-pad decoder output dim to 896 with zeros -> unmasked stores.
    wd_t_pad = jnp.zeros((HID_DIM, OUT_PAD), jnp.bfloat16)
    wd_t_pad = wd_t_pad.at[:, :IN_DIM].set(w_dec.T.astype(jnp.bfloat16))   # (20, 896)
    b_pad = jnp.zeros((1, OUT_PAD), jnp.float32).at[:, :IN_DIM].set(b_fused)
    return we_t, wd_t_pad, b_pad


@functools.partial(jax.jit, static_argnames=("row_tile",))
def autoencoder_forward_flat(x_flat, we_t, wd_t_pad, b_pad, *, row_tile=128):
    """Core path: (N, 784) f32 -> (N, 784) f32.  Stack many 16-row micro-batches
    into N; row tiles are pipelined over a 'parallel' grid axis (megacore on v7x)."""
    n = x_flat.shape[0]
    if n <= row_tile:
        tile, n_pad = n, n                         # single tile = whole array
    else:
        tile = row_tile
        n_pad = -(-n // tile) * tile
    if n_pad != n:
        x_flat = jnp.pad(x_flat, ((0, n_pad - n), (0, 0)))
    grid = (n_pad // tile,)

    cost = pl.CostEstimate(
        flops=2 * n_pad * IN_DIM * HID_DIM + 2 * n_pad * HID_DIM * OUT_PAD,
        transcendentals=0,
        bytes_accessed=(n_pad * IN_DIM * 4          # x (f32)
                        + IN_DIM * HID_DIM * 2      # We^T (bf16)
                        + HID_DIM * OUT_PAD * 2     # Wd^T padded (bf16)
                        + OUT_PAD * 4               # fused bias (f32)
                        + n_pad * OUT_PAD * 4))     # out (f32)

    out_pad = pl.pallas_call(
        autoencoder_kernel,
        out_shape=jax.ShapeDtypeStruct((n_pad, OUT_PAD), jnp.float32),
        grid=grid,
        in_specs=[
            pl.BlockSpec((tile, IN_DIM), lambda i: (i, 0)),
            pl.BlockSpec((IN_DIM, HID_DIM), lambda i: (0, 0)),   # broadcast
            pl.BlockSpec((HID_DIM, OUT_PAD), lambda i: (0, 0)),  # broadcast
            pl.BlockSpec((1, OUT_PAD), lambda i: (0, 0)),        # broadcast
        ],
        out_specs=pl.BlockSpec((tile, OUT_PAD), lambda i: (i, 0)),
        compiler_params=pltpu.CompilerParams(
            dimension_semantics=("parallel",)),
        cost_estimate=cost,
    )(x_flat, we_t, wd_t_pad, b_pad)

    # Trim the zero lane-padding (and any row padding) lazily.
    return out_pad[:n, :IN_DIM]


@jax.jit
def autoencoder_forward_nchw(x_nchw, we_t, wd_t_pad, b_pad):
    """Module-semantics wrapper: (B,1,28,28) f32 -> (B,1,28,28) f32.
    Prefer the flat path when the pipeline can produce/consume (N,784) directly
    (the NCHW<->flat reshapes are a TPU relayout)."""
    b = x_nchw.shape[0]
    x_flat = x_nchw.reshape(b, IN_DIM)               # x.view(batch_size, -1)
    out_flat = autoencoder_forward_flat(x_flat, we_t, wd_t_pad, b_pad)
    return out_flat.reshape(b, 1, 28, 28)            # .view(batch, 1, 28, 28)


def init_params(key):
    """Deterministic init mimicking PyTorch nn.Linear defaults
    (uniform in [-1/sqrt(fan_in), 1/sqrt(fan_in)])."""
    k1, k2, k3, k4 = jax.random.split(key, 4)
    bound_e = 1.0 / jnp.sqrt(IN_DIM)
    bound_d = 1.0 / jnp.sqrt(HID_DIM)
    w_enc = jax.random.uniform(k1, (HID_DIM, IN_DIM), jnp.float32, -bound_e, bound_e)
    b_enc = jax.random.uniform(k2, (HID_DIM,), jnp.float32, -bound_e, bound_e)
    w_dec = jax.random.uniform(k3, (IN_DIM, HID_DIM), jnp.float32, -bound_d, bound_d)
    b_dec = jax.random.uniform(k4, (IN_DIM,), jnp.float32, -bound_d, bound_d)
    return w_enc, b_enc, w_dec, b_dec


if __name__ == "__main__":
    key = jax.random.PRNGKey(0)
    k_x, k_p = jax.random.split(key)
    x = jax.random.normal(k_x, (BATCH, 1, 28, 28), jnp.float32)
    w_enc, b_enc, w_dec, b_dec = init_params(k_p)

    # One-time parameter preprocessing (transpose, bf16 cast, bias fold, pad).
    we_t, wd_t_pad, b_pad = preprocess_params(w_enc, b_enc, w_dec, b_dec)

    # --- Module-semantics path: batch_size = 16, NCHW in / NCHW out --------
    out = jax.block_until_ready(autoencoder_forward_nchw(x, we_t, wd_t_pad, b_pad))
    assert out.shape == (BATCH, 1, 28, 28)

    x_flat = x.reshape(BATCH, -1)
    # 1) Tight check: reference using the same bf16-rounded operands + fused
    #    bias as the kernel (matches kernel arithmetic modulo accumulation order).
    xb = x_flat.astype(jnp.bfloat16).astype(jnp.float32)
    h = xb @ we_t.astype(jnp.float32)
    hb = h.astype(jnp.bfloat16).astype(jnp.float32)
    ref_matched = (hb @ wd_t_pad[:, :IN_DIM].astype(jnp.float32)
                   + b_pad[:, :IN_DIM]).reshape(BATCH, 1, 28, 28)
    assert jnp.allclose(out, ref_matched, atol=1e-3, rtol=1e-3)

    # 2) Loose semantic check vs the exact f32 PyTorch-style forward
    #    (Linear(784->20) then Linear(20->784), no activation).
    ref_true = ((x_flat @ w_enc.T + b_enc) @ w_dec.T + b_dec).reshape(BATCH, 1, 28, 28)
    assert jnp.allclose(out, ref_true, atol=5e-2, rtol=5e-2)

    # --- Batched flat path: 16 micro-batches of 16 rows in ONE pallas_call --
    x_big = jnp.tile(x_flat, (16, 1))                               # (256, 784)
    out_big = jax.block_until_ready(
        autoencoder_forward_flat(x_big, we_t, wd_t_pad, b_pad))
    assert out_big.shape == (256, IN_DIM)
    assert jnp.allclose(out_big[:BATCH], out.reshape(BATCH, IN_DIM),
                        atol=1e-5, rtol=1e-5)

    print("KERNEL_OK")
</pallas_src>

<mosaic_0001>
module attributes {stable_mosaic.version = 11 : i64} {
  func.func @autoencoder_kernel(%arg0: i32, %arg1: memref<16x784xf32, #tpu.memory_space<vmem>>, %arg2: memref<784x20xbf16, #tpu.memory_space<vmem>>, %arg3: memref<20x896xbf16, #tpu.memory_space<vmem>>, %arg4: memref<1x896xf32, #tpu.memory_space<vmem>>, %arg5: memref<16x896xf32, #tpu.memory_space<vmem>>) attributes {dimension_semantics = [#tpu.dimension_semantics<parallel>], iteration_bounds = array<i64: 1>, scalar_prefetch = 0 : i64, scratch_operands = 0 : i64, tpu.core_type = #tpu.core_type<tc>, window_params = [{transform_indices = @transform_0, window_bounds = array<i64: 16, 784>}, {pipeline_mode = #tpu.pipeline_mode<synchronous>, transform_indices = @transform_1, window_bounds = array<i64: 784, 20>}, {pipeline_mode = #tpu.pipeline_mode<synchronous>, transform_indices = @transform_2, window_bounds = array<i64: 20, 896>}, {pipeline_mode = #tpu.pipeline_mode<synchronous>, transform_indices = @transform_3, window_bounds = array<i64: 1, 896>}, {transform_indices = @transform_4, window_bounds = array<i64: 16, 896>}]} {
    %c0 = arith.constant 0 : index
    %c0_0 = arith.constant 0 : index
    %0 = vector.load %arg1[%c0, %c0_0] : memref<16x784xf32, #tpu.memory_space<vmem>>, vector<16x784xf32>
    %1 = arith.truncf %0 : vector<16x784xf32> to vector<16x784xbf16>
    %c0_1 = arith.constant 0 : index
    %c0_2 = arith.constant 0 : index
    %2 = vector.load %arg2[%c0_1, %c0_2] : memref<784x20xbf16, #tpu.memory_space<vmem>>, vector<784x20xbf16>
    %cst = arith.constant dense<0.000000e+00> : vector<16x20xf32>
    %3 = tpu.matmul %1, %2, %cst {dimension_numbers = #tpu.dot_dimension_numbers<[1], [0], [0], [1], [0, 0, 1, 1], [], []>} : vector<16x784xbf16>, vector<784x20xbf16>, vector<16x20xf32> -> vector<16x20xf32>
    %4 = arith.truncf %3 : vector<16x20xf32> to vector<16x20xbf16>
    %c0_3 = arith.constant 0 : index
    %c0_4 = arith.constant 0 : index
    %5 = vector.load %arg3[%c0_3, %c0_4] : memref<20x896xbf16, #tpu.memory_space<vmem>>, vector<20x896xbf16>
    %cst_5 = arith.constant dense<0.000000e+00> : vector<16x896xf32>
    %6 = tpu.matmul %4, %5, %cst_5 {dimension_numbers = #tpu.dot_dimension_numbers<[1], [0], [0], [1], [0, 0, 1, 1], [], []>} : vector<16x20xbf16>, vector<20x896xbf16>, vector<16x896xf32> -> vector<16x896xf32>
    %c0_6 = arith.constant 0 : index
    %c0_7 = arith.constant 0 : index
    %7 = vector.load %arg4[%c0_6, %c0_7] : memref<1x896xf32, #tpu.memory_space<vmem>>, vector<1x896xf32>
    %8 = vector.broadcast %7 : vector<1x896xf32> to vector<16x896xf32>
    %9 = arith.addf %6, %8 : vector<16x896xf32>
    %c0_8 = arith.constant 0 : index
    %c0_9 = arith.constant 0 : index
    %10 = vector.load %arg5[%c0_8, %c0_9] : memref<16x896xf32, #tpu.memory_space<vmem>>, vector<16x896xf32>
    tpu.vector_store %arg5[%c0_8, %c0_9], %9 {strides = array<i32>} : memref<16x896xf32, #tpu.memory_space<vmem>>, vector<16x896xf32>,
    return
  }
  func.func @transform_0(%arg0: i32) -> (i32, i32) {
    %c0_i32 = arith.constant 0 : i32
    %c0_i32_0 = arith.constant 0 : i32
    return %arg0, %c0_i32 : i32, i32
  }
  func.func @transform_1(%arg0: i32) -> (i32, i32) {
    %c0_i32 = arith.constant 0 : i32
    %c0_i32_0 = arith.constant 0 : i32
    %c0_i32_1 = arith.constant 0 : i32
    return %c0_i32, %c0_i32_0 : i32, i32
  }
  func.func @transform_2(%arg0: i32) -> (i32, i32) {
    %c0_i32 = arith.constant 0 : i32
    %c0_i32_0 = arith.constant 0 : i32
    %c0_i32_1 = arith.constant 0 : i32
    return %c0_i32, %c0_i32_0 : i32, i32
  }
  func.func @transform_3(%arg0: i32) -> (i32, i32) {
    %c0_i32 = arith.constant 0 : i32
    %c0_i32_0 = arith.constant 0 : i32
    %c0_i32_1 = arith.constant 0 : i32
    return %c0_i32, %c0_i32_0 : i32, i32
  }
  func.func @transform_4(%arg0: i32) -> (i32, i32) {
    %c0_i32 = arith.constant 0 : i32
    %c0_i32_0 = arith.constant 0 : i32
    return %arg0, %c0_i32 : i32, i32
  }
}

</mosaic_0001>

<bundles_post_ra>
// kernel: autoencoder_forward_flat.1
= control target key start
LH: loop header
LB: loop body
LE: loop exit
PB: predicated region body
PF: predicated region fallthrough
CT: control target
= control target key end

     0   :  { %s1374_s0 = inlined_call_operand.vmem [shape: f32[16,784], index: 0, kind: input, shape index: {}]   ;;  %s1375_s1 = inlined_call_operand.vmem [shape: bf16[784,20], index: 1, kind: input, shape index: {}]   ;;  %s1376_s2 = inlined_call_operand.vmem [shape: bf16[20,896], index: 2, kind: input, shape index: {}]   ;;  %s1377_s3 = inlined_call_operand.vmem [shape: f32[1,896], index: 3, kind: input, shape index: {}]   ;;  %s1378_s4 = inlined_call_operand.hbm [shape: f32[16,896], index: 4, kind: output, shape index: {}]  }
   0x1   :  { %v1012_v0 = vld [vmem:[%s1375_s1 + $0x38] sm:$0xff]  ;;  %v1011_v4 = vld [vmem:[%s1375_s1 + $0x30] sm:$0xff]  ;;  %v1010_v8 = vld [vmem:[%s1375_s1 + $0x28] sm:$0xff] }
   0x2   :  { %v1020_v1 = vld [vmem:[%s1375_s1 + $0x78] sm:$0xff]  ;;  %436 = vmatpush.bf16.msra.mxu0 %v1012_v0  ;;  %v1019_v5 = vld [vmem:[%s1375_s1 + $0x70] sm:$0xff]  ;;  %v1018_v9 = vld [vmem:[%s1375_s1 + $0x68] sm:$0xff] }
   0x3   :  { %v1028_v2 = vld [vmem:[%s1375_s1 + $0xb8] sm:$0xff]  ;;  %450 = vmatpush.bf16.msra.mxu1 %v1020_v1  ;;  %v1027_v6 = vld [vmem:[%s1375_s1 + $0xb0] sm:$0xff]  ;;  %v1026_v10 = vld [vmem:[%s1375_s1 + $0xa8] sm:$0xff] }
   0x4   :  { %v1036_v3 = vld [vmem:[%s1375_s1 + $0xf8] sm:$0xff]  ;;  %464 = vmatpush.bf16.msra.mxu2 %v1028_v2  ;;  %v1035_v7 = vld [vmem:[%s1375_s1 + $0xf0] sm:$0xff]  ;;  %v1034_v11 = vld [vmem:[%s1375_s1 + $0xe8] sm:$0xff] }
   0x5   :  { %478 = vmatpush.bf16.msra.mxu3 %v1036_v3  ;;  %v1009_v12 = vld [vmem:[%s1375_s1 + $0x20] sm:$0xff]  ;;  %v1008_v16 = vld [vmem:[%s1375_s1 + $0x18] sm:$0xff] }
   0x6   :  { %437 = vmatpush.bf16.msra.mxu0 %v1011_v4  ;;  %v1017_v13 = vld [vmem:[%s1375_s1 + $0x60] sm:$0xff]  ;;  %v1016_v17 = vld [vmem:[%s1375_s1 + $0x58] sm:$0xff] }
   0x7   :  { %451 = vmatpush.bf16.msra.mxu1 %v1019_v5  ;;  %v1025_v14 = vld [vmem:[%s1375_s1 + $0xa0] sm:$0xff]  ;;  %v1024_v18 = vld [vmem:[%s1375_s1 + $0x98] sm:$0xff] }
   0x8   :  { %465 = vmatpush.bf16.msra.mxu2 %v1027_v6  ;;  %v1033_v15 = vld [vmem:[%s1375_s1 + $0xe0] sm:$0xff]  ;;  %v1032_v19 = vld [vmem:[%s1375_s1 + $0xd8] sm:$0xff] }
   0x9   :  { %479 = vmatpush.bf16.msra.mxu3 %v1035_v7 }
   0xa   :  { %438 = vmatpush.bf16.msra.mxu0 %v1010_v8 }
   0xb   :  { %452 = vmatpush.bf16.msra.mxu1 %v1018_v9 }
   0xc   :  { %466 = vmatpush.bf16.msra.mxu2 %v1026_v10 }
   0xd   :  { %480 = vmatpush.bf16.msra.mxu3 %v1034_v11 }
   0xe   :  { %439 = vmatpush.bf16.msra.mxu0 %v1009_v12 }
   0xf   :  { %453 = vmatpush.bf16.msra.mxu1 %v1017_v13 }
  0x10   :  { %467 = vmatpush.bf16.msra.mxu2 %v1025_v14 }
  0x11   :  { %481 = vmatpush.bf16.msra.mxu3 %v1033_v15 }
  0x12   :  { %9 = vsyncpa [#allocation3], 0  ;;  %440 = vmatpush.bf16.msra.mxu0 %v1008_v16  ;;  %v1007_v20 = vld [vmem:[%s1375_s1 + $0x10] sm:$0xff]  ;;  %v1006_v24 = vld [vmem:[%s1375_s1 + $0x8] sm:$0xff]  ;;  %vm432_vm0 = vcmask 130048   ;;  %vm621_vm1 = vcmask 1041408  }
  0x13   :  { %454 = vmatpush.bf16.msra.mxu1 %v1016_v17  ;;  %v1015_v21 = vld [vmem:[%s1375_s1 + $0x50] sm:$0xff]  ;;  %v1014_v25 = vld [vmem:[%s1375_s1 + $0x48] sm:$0xff]  ;;  %v1005_v28 = vld [vmem:[%s1375_s1] sm:$0xff]  ;;  %vm617_vm2 = vcmask 162816   ;;  %s761_s21 = sshll.u32 %s1378_s4, 4  ;;  %s1091_s22 = smov 896   ;;  %s762_s21 = int_to_ptr.hbm [resolvable:$true] %s761_s21 }
  0x14   :  { %468 = vmatpush.bf16.msra.mxu2 %v1024_v18  ;;  %v1023_v22 = vld [vmem:[%s1375_s1 + $0x90] sm:$0xff]  ;;  %v1022_v26 = vld [vmem:[%s1375_s1 + $0x88] sm:$0xff]  ;;  %v1013_v29 = vld [vmem:[%s1375_s1 + $0x40] sm:$0xff]  ;;  %s1092_s23 = smov 56  }
  0x15   :  { %482 = vmatpush.bf16.msra.mxu3 %v1032_v19  ;;  %v1031_v23 = vld [vmem:[%s1375_s1 + $0xd0] sm:$0xff]  ;;  %v1030_v27 = vld [vmem:[%s1375_s1 + $0xc8] sm:$0xff]  ;;  %v1021_v30 = vld [vmem:[%s1375_s1 + $0x80] sm:$0xff] }
  0x16   :  { %441 = vmatpush.bf16.msra.mxu0 %v1007_v20  ;;  %v1044_v31 = vld [vmem:[%s1375_s1 + $0x138] sm:$0xff]  ;;  %v19_v32 = vld [vmem:[%s1374_s0] sm:$0xff]  ;;  %v20_v34 = vld [vmem:[%s1374_s0 + $0x8] sm:$0xff] }
  0x17   :  { %455 = vmatpush.bf16.msra.mxu1 %v1015_v21  ;;  %v26_v33 = vld [vmem:[%s1374_s0 + $0x38] sm:$0xff]  ;;  %v27_v35 = vld [vmem:[%s1374_s0 + $0x40] sm:$0xff]  ;;  %v21_v37 = vld [vmem:[%s1374_s0 + $0x10] sm:$0xff] }
  0x18   :  { %469 = vmatpush.bf16.msra.mxu2 %v1023_v22  ;;  %v1052_v36 = vld [vmem:[%s1375_s1 + $0x178] sm:$0xff]  ;;  %v28_v38 = vld [vmem:[%s1374_s0 + $0x48] sm:$0xff]  ;;  %v1029_v39 = vld [vmem:[%s1375_s1 + $0xc0] sm:$0xff]  ;;  %v33_v42 = vpack.c.bf16 %v26_v33, %v19_v32  ;;  %v34_v43 = vpack.c.bf16 %v27_v35, %v20_v34 }
  0x19   :  { %483 = vmatpush.bf16.msra.mxu3 %v1031_v23  ;;  %v22_v40 = vld [vmem:[%s1374_s0 + $0x18] sm:$0xff]  ;;  %v29_v41 = vld [vmem:[%s1374_s0 + $0x50] sm:$0xff]  ;;  %v35_v44 = vpack.c.bf16 %v28_v38, %v21_v37  ;;  %v1053_v48 = vld [vmem:[%s1375_s1 + $0x180] sm:$0xff] }
  0x1a   :  { %442 = vmatpush.bf16.msra.mxu0 %v1006_v24  ;;  %v1043_v45 = vld [vmem:[%s1375_s1 + $0x130] sm:$0xff]  ;;  %v36_v46 = vpack.c.bf16 %v29_v41, %v22_v40  ;;  %v1042_v49 = vld [vmem:[%s1375_s1 + $0x128] sm:$0xff]  ;;  %v1041_v51 = vld [vmem:[%s1375_s1 + $0x120] sm:$0xff] }
  0x1b   :  { %456 = vmatpush.bf16.msra.mxu1 %v1014_v25  ;;  %v1051_v47 = vld [vmem:[%s1375_s1 + $0x170] sm:$0xff]  ;;  %v1050_v50 = vld [vmem:[%s1375_s1 + $0x168] sm:$0xff]  ;;  %v1049_v52 = vld [vmem:[%s1375_s1 + $0x160] sm:$0xff] }
  0x1c   :  { %470 = vmatpush.bf16.msra.mxu2 %v1022_v26  ;;  %v1040_v53 = vld [vmem:[%s1375_s1 + $0x118] sm:$0xff]  ;;  %v25_v54 = vld [vmem:[%s1374_s0 + $0x30] sm:$0xff]  ;;  %v32_v55 = vld [vmem:[%s1374_s0 + $0x68] sm:$0xff] }
  0x1d   :  { %484 = vmatpush.bf16.msra.mxu3 %v1030_v27  ;;  %v1048_v56 = vld [vmem:[%s1375_s1 + $0x158] sm:$0xff]  ;;  %v39_v57 = vpack.c.bf16 %v32_v55, %v25_v54  ;;  %v1039_v58 = vld [vmem:[%s1375_s1 + $0x110] sm:$0xff]  ;;  %v1038_v60 = vld [vmem:[%s1375_s1 + $0x108] sm:$0xff] }
  0x1e   :  { %443 = vmatpush.bf16.msra.mxu0 %v1005_v28  ;;  %v1047_v59 = vld [vmem:[%s1375_s1 + $0x150] sm:$0xff]  ;;  %v1046_v61 = vld [vmem:[%s1375_s1 + $0x148] sm:$0xff]  ;;  %v1037_v62 = vld [vmem:[%s1375_s1 + $0x100] sm:$0xff] }
  0x1f   :  { %457 = vmatpush.bf16.msra.mxu1 %v1013_v29  ;;  %v23_v63 = vld [vmem:[%s1374_s0 + $0x20] sm:$0xff]  ;;  %v30_v0 = vld [vmem:[%s1374_s0 + $0x58] sm:$0xff]  ;;  %v24_v2 = vld [vmem:[%s1374_s0 + $0x28] sm:$0xff] }
  0x20   :  { %471 = vmatpush.bf16.msra.mxu2 %v1021_v30  ;;  %v1045_v1 = vld [vmem:[%s1375_s1 + $0x140] sm:$0xff]  ;;  %v37_v4 = vpack.c.bf16 %v30_v0, %v23_v63  ;;  %v543_v6 = vld [vmem:[%s1376_s2 + $0x38] sm:$0x33]  ;;  %v545_v11 = vld [vmem:[%s1376_s2 + $0x48] sm:$0x33] }
  0x21   :  { %485 = vmatpush.bf16.msra.mxu3 %v1029_v39  ;;  %444 = vmatmul.bf16.vlgmr.msra.gmra.mxu0 %v33_v42  ;;  %v31_v3 = vld [vmem:[%s1374_s0 + $0x60] sm:$0xff]  ;;  %v589_v8 = vunpack.c.l.b16 %v543_v6  ;;  %v590_v9 = vunpack.c.h.b16 %v543_v6  ;;  %v593_v12 = vunpack.c.l.b16 %v545_v11  ;;  %v1057_v22 = vld [vmem:[%s1376_s2 + $0x18] sm:$0xf0]  ;;  %v1055_v26 = vld [vmem:[%s1376_s2 + $0xc] sm:$0xf]  ;;  %v594_v37 = vunpack.c.h.b16 %v545_v11 }
  0x22   :  { %492 = vmatpush.bf16.msrb.mxu0 %v1044_v31  ;;  %458 = vmatmul.bf16.vlgmr.msra.gmra.mxu1 %v34_v43  ;;  %v38_v5 = vpack.c.bf16 %v31_v3, %v24_v2  ;;  %v544_v7 = vld [vmem:[%s1376_s2 + $0x40] sm:$0x33]  ;;  %v982_v27 = vld [vmem:[%s1376_s2 + $0x24] sm:$0xf0]  ;;  %v988_v31 = vld [vmem:[%s1376_s2 + $0x10] sm:$0xf] }
  0x23   :  { %506 = vmatpush.bf16.msrb.mxu1 %v1052_v36  ;;  %472 = vmatmul.bf16.vlgmr.msra.gmra.mxu2 %v35_v44  ;;  %v592_v10 = vunpack.c.h.b16 %v544_v7  ;;  %v603_v13 = vpack.c.b16 %v589_v8, %v589_v8  ;;  %v604_v14 = vpack.c.b16 %v590_v9, %v590_v9  ;;  %v607_v16 = vpack.c.b16 %v593_v12, %v593_v12  ;;  %v972_v21 = vld [vmem:[%s1376_s2] sm:$0xf]  ;;  %v1054_v23 = vld [vmem:[%s1376_s2 + $0x4] sm:$0xf]  ;;  %v1059_v32 = vld [vmem:[%s1376_s2 + $0x28] sm:$0xf0] }
  0x24   :  { %486 = vmatmul.bf16.vlgmr.msra.gmra.mxu3 %v36_v46  ;;  %527 = vmatpush.bf16.msrb.mxu2 %v1053_v48  ;;  %v973_v24 = vor.u32 %v1057_v22, %v972_v21  ;;  %v974_v25 = vld [vmem:[%s1376_s2 + $0x1c] sm:$0xf0]  ;;  %v985_v30 = vor.u32 %v1055_v26, %v982_v27  ;;  %v989_v34 = vor.u32 %v1059_v32, %v988_v31  ;;  %v591_v36 = vunpack.c.l.b16 %v544_v7  ;;  %v980_v39 = vld [vmem:[%s1376_s2 + $0x8] sm:$0xf]  ;;  %v1058_v40 = vld [vmem:[%s1376_s2 + $0x20] sm:$0xf0] }
  0x25   :  { %v606_v15 = vpack.c.b16 %v592_v10, %v592_v10  ;;  %v623_v17 = vsel %vm621_vm1, %v603_v13, 0  ;;  %v626_v18 = vsel %vm621_vm1, %v604_v14, 0  ;;  %v635_v20 = vsel %vm621_vm1, %v607_v16, 0  ;;  %v1056_v42 = vld [vmem:[%s1376_s2 + $0x14] sm:$0xf] }
  0x26   :  { %493 = vmatpush.bf16.msrb.mxu0 %v1043_v45  ;;  %649 = vmatpush.bf16.msrb.mxu3 %v623_v17  ;;  %v977_v29 = vor.u32 %v1054_v23, %v974_v25  ;;  %v605_v38 = vpack.c.b16 %v591_v36, %v591_v36  ;;  %v608_v41 = vpack.c.b16 %v594_v37, %v594_v37  ;;  %v990_v43 = vld [vmem:[%s1376_s2 + $0x2c] sm:$0xf0]  ;;  %v996_v12 = vld [vmem:[%s1376_s2 + $0x18] sm:$0xf]  ;;  %v1060_v13 = vld [vmem:[%s1376_s2 + $0x30] sm:$0xf0] }
  0x27   :  { %507 = vmatpush.bf16.msrb.mxu1 %v1051_v47  ;;  %v632_v19 = vsel %vm621_vm1, %v606_v15, 0  ;;  %v981_v45 = vor.u32 %v1058_v40, %v980_v39  ;;  %v993_v47 = vor.u32 %v1056_v42, %v990_v43  ;;  %v997_v14 = vor.u32 %v1060_v13, %v996_v12  ;;  %v547_v15 = vld [vmem:[%s1377_s3] sm:$0xff] }
  0x28   :  { %663 = vmatpush.bf16.msra.mxu2 %v626_v18  ;;  %v629_v44 = vsel %vm621_vm1, %v605_v38, 0  ;;  %v638_v46 = vsel %vm621_vm1, %v608_v41, 0  ;;  %v552_v16 = vperm.slane %v547_v15, 3  ;;  %v553_v17 = vperm.slane %v547_v15, 4 }
  0x29   :  { %v549_v22 = vperm.slane %v547_v15, 0  ;;  %v550_v23 = vperm.slane %v547_v15, 1  ;;  %v551_v36 = vperm.slane %v547_v15, 2  ;;  %v554_v37 = vperm.slane %v547_v15, 5 }
  0x2a   :  { %494 = vmatpush.bf16.msrb.mxu0 %v1042_v49  ;;  %650 = vmatpush.bf16.msrb.mxu3 %v973_v24 }
  0x2b   :  { %508 = vmatpush.bf16.msrb.mxu1 %v1050_v50 }
  0x2c   :  { %664 = vmatpush.bf16.msra.mxu2 %v977_v29 }
  0x2e   :  { %495 = vmatpush.bf16.msrb.mxu0 %v1041_v51  ;;  %677 = vmatpush.bf16.msra.mxu3 %v629_v44 }
  0x2f   :  { %509 = vmatpush.bf16.msrb.mxu1 %v1049_v52 }
  0x32   :  { %496 = vmatpush.bf16.msrb.mxu0 %v1040_v53  ;;  %678 = vmatpush.bf16.msra.mxu3 %v981_v45 }
  0x33   :  { %510 = vmatpush.bf16.msrb.mxu1 %v1048_v56  ;;  %969 = vmatmul.msk.bf16.vlgmr.msrb.gmra.mxu2 %vm432_vm0, %v39_v57 }
  0x34   :  { %719 = vmatpush.bf16.msrb.mxu2 %v638_v46  ;;  %v555_v46 = vperm.slane %v547_v15, 6 }
  0x36   :  { %497 = vmatpush.bf16.msrb.mxu0 %v1039_v58 }
  0x37   :  { %511 = vmatpush.bf16.msrb.mxu1 %v1047_v59 }
  0x38   :  { %720 = vmatpush.bf16.msrb.mxu2 %v993_v47 }
  0x3a   :  { %498 = vmatpush.bf16.msrb.mxu0 %v1038_v60 }
  0x3b   :  { %512 = vmatpush.bf16.msrb.mxu1 %v1046_v61 }
  0x3e   :  { %499 = vmatpush.bf16.msrb.mxu0 %v1037_v62  ;;  %v546_v62 = vld [vmem:[%s1376_s2 + $0x50] sm:$0x3]  ;;  %s1090_s2 = smov [#allocation2]  }
  0x3f   :  { %513 = vmatpush.bf16.msrb.mxu1 %v1045_v1  ;;  %v595_v1 = vunpack.c.l.b16 %v546_v62  ;;  %s759_s3 = sshll.u32 %s1090_s2, 4  ;;  %s760_s3 = int_to_ptr.vmem [resolvable:$true] %s759_s3 }
  0x41   :  { %500 = vmatmul.bf16.vlgmr.msrb.gmra.mxu0 %v37_v4  ;;  %v609_v7 = vpack.c.b16 %v595_v1, %v595_v1 }
  0x42   :  { %514 = vmatmul.bf16.vlgmr.msrb.gmra.mxu1 %v38_v5  ;;  %691 = vmatpush.bf16.msra.mxu0 %v632_v19 }
  0x43   :  { %705 = vmatpush.bf16.msra.mxu1 %v635_v20  ;;  %v641_v11 = vsel %vm621_vm1, %v609_v7, 0 }
  0x46   :  { %692 = vmatpush.bf16.msra.mxu0 %v985_v30 }
  0x47   :  { %706 = vmatpush.bf16.msra.mxu1 %v989_v34 }
  0x9e   :  { %v445_v28 = vpop.f32.mrf.mxu0 }
  0x9f   :  { %v459_v33 = vpop.f32.mrf.mxu1 }
  0xa0   :  { %v460_v52 = vadd.f32 %v459_v33, %v445_v28 }
  0xa6   :  { %v473_v35 = vpop.f32.mrf.mxu2  ;;  %v447_v48 = vpop.f32.mrf.mxu0 }
  0xa7   :  { %v461_v49 = vpop.f32.mrf.mxu1  ;;  %v487_v50 = vpop.f32.mrf.mxu3  ;;  %v474_v53 = vadd.f32 %v473_v35, %v460_v52 }
  0xa8   :  { %v462_v54 = vadd.f32 %v461_v49, %v447_v48 }
  0xa9   :  { %v488_v58 = vadd.f32 %v487_v50, %v474_v53 }
  0xae   :  { %v475_v51 = vpop.f32.mrf.mxu2 }
  0xaf   :  { %v476_v59 = vadd.f32 %v475_v51, %v462_v54  ;;  %v489_v60 = vpop.f32.mrf.mxu3 }
  0xb1   :  { %v490_v63 = vadd.f32 %v489_v60, %v476_v59 }
  0xb6   :  { %v529_v57 = vpop.f32.mrf.mxu2 }
  0xbe   :  { %v501_v55 = vpop.f32.mrf.mxu0  ;;  %v531_v6 = vpop.f32.mrf.mxu2 }
  0xbf   :  { %v515_v56 = vpop.f32.mrf.mxu1  ;;  %v502_v61 = vadd.f32 %v501_v55, %v488_v58 }
  0xc1   :  { %v516_v2 = vadd.f32 %v515_v56, %v502_v61 }
  0xc3   :  { %v530_v8 = vadd.f32 %v529_v57, %v516_v2 }
  0xc6   :  { %v503_v0 = vpop.f32.mrf.mxu0 }
  0xc7   :  { %v504_v3 = vadd.f32 %v503_v0, %v490_v63  ;;  %v517_v4 = vpop.f32.mrf.mxu1 }
  0xc9   :  { %v518_v5 = vadd.f32 %v517_v4, %v504_v3 }
  0xcb   :  { %v532_v9 = vadd.f32 %v531_v6, %v518_v5 }
  0xcd   :  { %v534_v10 = vpack.c.bf16 %v532_v9, %v530_v8 }
  0xcf   :  { %998 = vmatmul.msk.bf16.vlgmr.msrb.gmra.mxu3 %vm617_vm2, %v534_v10  ;;  %999 = vmatmul.msk.bf16.vlgmr.msra.gmra.mxu2 %vm617_vm2, %v534_v10 }
  0xd0   :  { %1001 = vmatmul.msk.bf16.vlgmr.msra.gmra.mxu0 %vm617_vm2, %v534_v10  ;;  %1002 = vmatmul.msk.bf16.vlgmr.msra.gmra.mxu1 %vm617_vm2, %v534_v10 }
  0xd1   :  { %733 = vmatpush.bf16.msrb.mxu3 %v641_v11 }
  0xd5   :  { %734 = vmatpush.bf16.msrb.mxu3 %v997_v14 }
  0xdf   :  { %1000 = vmatmul.msk.bf16.vlgmr.msra.gmra.mxu3 %vm617_vm2, %v534_v10  ;;  %1003 = vmatmul.msk.bf16.vlgmr.msrb.gmra.mxu2 %vm617_vm2, %v534_v10 }
  0xef   :  { %1004 = vmatmul.msk.bf16.vlgmr.msrb.gmra.mxu3 %vm617_vm2, %v534_v10 }
 0x14d   :  { %v694_v18 = vpop.f32.mrf.mxu0  ;;  %v708_v19 = vpop.f32.mrf.mxu1 }
 0x14e   :  { %v695_v20 = vadd.f32 %v694_v18, %v552_v16  ;;  %v709_v21 = vadd.f32 %v708_v19, %v553_v17 }
 0x150   :  { %744 = vst [vmem:[#allocation2 + $0x18] sm:$0xff] %v695_v20 }
 0x151   :  { %745 = vst [vmem:[#allocation2 + $0x20] sm:$0xff] %v709_v21 }
 0x152   :  { %v652_v24 = vpop.f32.mrf.mxu3  ;;  %v666_v25 = vpop.f32.mrf.mxu2 }
 0x153   :  { %v653_v26 = vadd.f32 %v652_v24, %v549_v22  ;;  %v667_v27 = vadd.f32 %v666_v25, %v550_v23 }
 0x155   :  { %741 = vst [vmem:[#allocation2] sm:$0xff] %v653_v26  ;;  %v696_v28 = vpop.f32.mrf.mxu0  ;;  %v710_v29 = vpop.f32.mrf.mxu1 }
 0x156   :  { %742 = vst [vmem:[#allocation2 + $0x8] sm:$0xff] %v667_v27  ;;  %v697_v30 = vadd.f32 %v696_v28, %v552_v16  ;;  %v711_v31 = vadd.f32 %v710_v29, %v553_v17 }
 0x158   :  { %751 = vst [vmem:[#allocation2 + $0x50] sm:$0xff] %v697_v30 }
 0x159   :  { %752 = vst [vmem:[#allocation2 + $0x58] sm:$0xff] %v711_v31 }
 0x15a   :  { %v654_v32 = vpop.f32.mrf.mxu3  ;;  %v668_v33 = vpop.f32.mrf.mxu2 }
 0x15b   :  { %v655_v34 = vadd.f32 %v654_v32, %v549_v22  ;;  %v669_v35 = vadd.f32 %v668_v33, %v550_v23 }
 0x15d   :  { %748 = vst [vmem:[#allocation2 + $0x38] sm:$0xff] %v655_v34 }
 0x15e   :  { %749 = vst [vmem:[#allocation2 + $0x40] sm:$0xff] %v669_v35 }
 0x162   :  { %v680_v38 = vpop.f32.mrf.mxu3  ;;  %v722_v39 = vpop.f32.mrf.mxu2 }
 0x163   :  { %v681_v40 = vadd.f32 %v680_v38, %v551_v36  ;;  %v723_v41 = vadd.f32 %v722_v39, %v554_v37 }
 0x165   :  { %743 = vst [vmem:[#allocation2 + $0x10] sm:$0xff] %v681_v40 }
 0x166   :  { %746 = vst [vmem:[#allocation2 + $0x28] sm:$0xff] %v723_v41 }
 0x16a   :  { %v682_v42 = vpop.f32.mrf.mxu3  ;;  %v724_v43 = vpop.f32.mrf.mxu2 }
 0x16b   :  { %v683_v44 = vadd.f32 %v682_v42, %v551_v36  ;;  %v725_v45 = vadd.f32 %v724_v43, %v554_v37 }
 0x16d   :  { %750 = vst [vmem:[#allocation2 + $0x48] sm:$0xff] %v683_v44 }
 0x16e   :  { %753 = vst [vmem:[#allocation2 + $0x60] sm:$0xff] %v725_v45 }
 0x172   :  { %v736_v47 = vpop.f32.mrf.mxu3 }
 0x173   :  { %v737_v48 = vadd.f32 %v736_v47, %v555_v46 }
 0x175   :  { %747 = vst [vmem:[#allocation2 + $0x30] sm:$0xff] %v737_v48 }
 0x17a   :  { %v738_v49 = vpop.f32.mrf.mxu3 }
 0x17b   :  { %v739_v50 = vadd.f32 %v738_v49, %v555_v46 }
 0x17d   :  { %754 = vst [vmem:[#allocation2 + $0x68] sm:$0xff] %v739_v50 }
 0x17e   :  { %767 = dma.vmem_to_hbm [thread:$0]  %s760_s3, 1792, %s762_s21, [#allocation3], %s1091_s22, %s1091_s22, %s1092_s23  }
 0x17f   :  { %1088 = dma.done.wait [#allocation3], 1792  }
 0x180   :  { %1089 = vsyncadd [#allocation3], 4294965504 }
 0x181   :  { %772 = vsyncpa [#allocation3], 1 }

</bundles_post_ra>
